<compile_context>
chip_gen: v6e
topology: v6e:2x2x1
jax: 0.10.0
libtpu: 0.0.40
codegen_flags: <defaults>
</compile_context>

<pallas_src>
import jax
import jax.numpy as jnp
import numpy as np
from jax.experimental import pallas as pl
from jax.experimental.pallas import tpu as pltpu

_LANE = 128


def _round_up(x, m):
    return (x + m - 1) // m * m


def actor_kernel(x_ref, w1_ref, b1_ref, w2_ref, b2_ref, o_ref):
    """One batch tile: o = tanh(relu(x @ W1 + b1) @ W2 + b2)."""
    cdt = w1_ref.dtype  # matmul operand dtype (bf16 by default)
    h = jnp.dot(x_ref[...].astype(cdt), w1_ref[...],
                preferred_element_type=jnp.float32)
    h = jnp.maximum(h + b1_ref[...], 0.0)                  # f32 bias + ReLU (VPU)
    y = jnp.dot(h.astype(cdt), w2_ref[...],
                preferred_element_type=jnp.float32)
    o_ref[...] = jnp.tanh(y + b2_ref[...]).astype(o_ref.dtype)   # f32 tanh (EUP)


def actor_forward(state, w1, b1, w2, b2, *, block_batch=None,
                  mxu_dtype=jnp.bfloat16):
    """state: [B, S]; w1: [S, H]; b1: [H]/[1,H]; w2: [H, A]; b2: [A]/[1,A].

    Returns [B, A] float32.  Weights are stored as [in, out] (transpose of the
    PyTorch [out, in]) so the kernel computes x @ W + b directly on the MXU.
    """
    state = jnp.asarray(state, jnp.float32)
    w1 = jnp.asarray(w1, jnp.float32)
    w2 = jnp.asarray(w2, jnp.float32)
    b1 = jnp.asarray(b1, jnp.float32).reshape(1, -1)
    b2 = jnp.asarray(b2, jnp.float32).reshape(1, -1)

    B, S = state.shape
    S_, H = w1.shape
    H_, A = w2.shape
    assert S == S_ and H == H_ and b1.shape[1] == H and b2.shape[1] == A

    # Lane-dense padding of the feature dims (exact no-op for the math).
    S_p = _round_up(S, _LANE)
    H_p = _round_up(H, _LANE)
    A_p = _round_up(A, _LANE)

    # Batch tile: 256-multiple once the batch is large, otherwise one padded tile.
    if block_batch is None:
        block_batch = 256 if B >= 256 else _round_up(B, 8)
    tm = block_batch
    B_p = _round_up(B, tm)

    x_p = jnp.pad(state, ((0, B_p - B), (0, S_p - S)))
    w1_p = jnp.pad(w1, ((0, S_p - S), (0, H_p - H))).astype(mxu_dtype)
    b1_p = jnp.pad(b1, ((0, 0), (0, H_p - H)))
    w2_p = jnp.pad(w2, ((0, H_p - H), (0, A_p - A))).astype(mxu_dtype)
    b2_p = jnp.pad(b2, ((0, 0), (0, A_p - A)))

    grid = (B_p // tm,)
    wbytes = jnp.dtype(mxu_dtype).itemsize
    cost = pl.CostEstimate(
        flops=2 * B_p * (S_p * H_p + H_p * A_p),
        transcendentals=B_p * A_p,
        bytes_accessed=(x_p.size * 4 + B_p * A_p * 4
                        + w1_p.size * wbytes + w2_p.size * wbytes
                        + b1_p.size * 4 + b2_p.size * 4),
    )

    out = pl.pallas_call(
        actor_kernel,
        out_shape=jax.ShapeDtypeStruct((B_p, A_p), jnp.float32),
        grid=grid,
        in_specs=[
            pl.BlockSpec((tm, S_p), lambda i: (i, 0)),    # x: streamed per batch tile
            pl.BlockSpec((S_p, H_p), lambda i: (0, 0)),   # W1: VMEM-resident
            pl.BlockSpec((1, H_p), lambda i: (0, 0)),     # b1: VMEM-resident
            pl.BlockSpec((H_p, A_p), lambda i: (0, 0)),   # W2: VMEM-resident
            pl.BlockSpec((1, A_p), lambda i: (0, 0)),     # b2: VMEM-resident
        ],
        out_specs=pl.BlockSpec((tm, A_p), lambda i: (i, 0)),
        compiler_params=pltpu.CompilerParams(
            dimension_semantics=("parallel",)),
        cost_estimate=cost,
    )(x_p, w1_p, b1_p, w2_p, b2_p)

    return out[:B, :A]


def init_actor_params(key, state_dim, action_dim, hidden=256):
    """Mirror the PyTorch module's init:
       - params_reset(): fc1 weights ~ U(-1/sqrt(weight.size(0)), ...) where
         weight.size(0) = out_features = hidden (what `limits()` computes).
       - fc2 weights ~ U(-3e-3, 3e-3).
       - biases keep nn.Linear's default U(-1/sqrt(in_features), ...)."""
    k1, k2, k3, k4 = jax.random.split(key, 4)
    lim1_w = 1.0 / np.sqrt(hidden)
    lim1_b = 1.0 / np.sqrt(state_dim)
    lim2_b = 1.0 / np.sqrt(hidden)
    w1 = jax.random.uniform(k1, (state_dim, hidden), jnp.float32, -lim1_w, lim1_w)
    b1 = jax.random.uniform(k2, (1, hidden), jnp.float32, -lim1_b, lim1_b)
    w2 = jax.random.uniform(k3, (hidden, action_dim), jnp.float32, -3e-3, 3e-3)
    b2 = jax.random.uniform(k4, (1, action_dim), jnp.float32, -lim2_b, lim2_b)
    return w1, b1, w2, b2


if __name__ == "__main__":
    key = jax.random.PRNGKey(0)
    state_dim, action_dim, hidden = 24, 4, 256
    kx, kp, kx2 = jax.random.split(key, 3)
    w1, b1, w2, b2 = init_actor_params(kp, state_dim, action_dim, hidden)

    def ref_f32(x):
        return jnp.tanh(jnp.maximum(x @ w1 + b1, 0.0) @ w2 + b2)

    def ref_bf16(x):
        # Same bf16-operand / f32-accumulate recipe as the kernel.
        h = jnp.dot(x.astype(jnp.bfloat16), w1.astype(jnp.bfloat16),
                    preferred_element_type=jnp.float32) + b1
        h = jnp.maximum(h, 0.0)
        y = jnp.dot(h.astype(jnp.bfloat16), w2.astype(jnp.bfloat16),
                    preferred_element_type=jnp.float32) + b2
        return jnp.tanh(y)

    # Small batch: single padded batch tile (one grid step).
    state = jax.random.normal(kx, (8, state_dim), jnp.float32)
    out = jax.block_until_ready(actor_forward(state, w1, b1, w2, b2))
    assert out.shape == (8, action_dim)
    np.testing.assert_allclose(np.asarray(out), np.asarray(ref_bf16(state)),
                               rtol=1e-3, atol=1e-4)
    np.testing.assert_allclose(np.asarray(out), np.asarray(ref_f32(state)),
                               rtol=5e-2, atol=2e-3)

    # Larger batch: multi-step parallel grid (TM=256) with VMEM-resident weights.
    state_big = jax.random.normal(kx2, (512, state_dim), jnp.float32)
    out_big = jax.block_until_ready(actor_forward(state_big, w1, b1, w2, b2))
    assert out_big.shape == (512, action_dim)
    np.testing.assert_allclose(np.asarray(out_big), np.asarray(ref_bf16(state_big)),
                               rtol=1e-3, atol=1e-4)
    np.testing.assert_allclose(np.asarray(out_big), np.asarray(ref_f32(state_big)),
                               rtol=5e-2, atol=2e-3)

    print("KERNEL_OK")
</pallas_src>

<mosaic_0001>
module attributes {stable_mosaic.version = 11 : i64} {
  func.func @actor_kernel(%arg0: i32, %arg1: memref<8x128xf32, #tpu.memory_space<vmem>>, %arg2: memref<128x256xbf16, #tpu.memory_space<vmem>>, %arg3: memref<1x256xf32, #tpu.memory_space<vmem>>, %arg4: memref<256x128xbf16, #tpu.memory_space<vmem>>, %arg5: memref<1x128xf32, #tpu.memory_space<vmem>>, %arg6: memref<8x128xf32, #tpu.memory_space<vmem>>) attributes {dimension_semantics = [#tpu.dimension_semantics<parallel>], iteration_bounds = array<i64: 1>, scalar_prefetch = 0 : i64, scratch_operands = 0 : i64, tpu.core_type = #tpu.core_type<tc>, window_params = [{transform_indices = @transform_0, window_bounds = array<i64: 8, 128>}, {pipeline_mode = #tpu.pipeline_mode<synchronous>, transform_indices = @transform_1, window_bounds = array<i64: 128, 256>}, {pipeline_mode = #tpu.pipeline_mode<synchronous>, transform_indices = @transform_2, window_bounds = array<i64: 1, 256>}, {pipeline_mode = #tpu.pipeline_mode<synchronous>, transform_indices = @transform_3, window_bounds = array<i64: 256, 128>}, {pipeline_mode = #tpu.pipeline_mode<synchronous>, transform_indices = @transform_4, window_bounds = array<i64: 1, 128>}, {transform_indices = @transform_5, window_bounds = array<i64: 8, 128>}]} {
    %c0 = arith.constant 0 : index
    %c0_0 = arith.constant 0 : index
    %0 = vector.load %arg1[%c0, %c0_0] : memref<8x128xf32, #tpu.memory_space<vmem>>, vector<8x128xf32>
    %1 = arith.truncf %0 : vector<8x128xf32> to vector<8x128xbf16>
    %c0_1 = arith.constant 0 : index
    %c0_2 = arith.constant 0 : index
    %2 = vector.load %arg2[%c0_1, %c0_2] : memref<128x256xbf16, #tpu.memory_space<vmem>>, vector<128x256xbf16>
    %cst = arith.constant dense<0.000000e+00> : vector<8x256xf32>
    %3 = tpu.matmul %1, %2, %cst {dimension_numbers = #tpu.dot_dimension_numbers<[1], [0], [0], [1], [0, 0, 1, 1], [], []>} : vector<8x128xbf16>, vector<128x256xbf16>, vector<8x256xf32> -> vector<8x256xf32>
    %c0_3 = arith.constant 0 : index
    %c0_4 = arith.constant 0 : index
    %4 = vector.load %arg3[%c0_3, %c0_4] : memref<1x256xf32, #tpu.memory_space<vmem>>, vector<1x256xf32>
    %5 = vector.broadcast %4 : vector<1x256xf32> to vector<8x256xf32>
    %6 = arith.addf %3, %5 : vector<8x256xf32>
    %cst_5 = arith.constant 0.000000e+00 : f32
    %7 = vector.broadcast %cst_5 : f32 to vector<8x256xf32>
    %8 = arith.maximumf %6, %7 : vector<8x256xf32>
    %9 = arith.truncf %8 : vector<8x256xf32> to vector<8x256xbf16>
    %c0_6 = arith.constant 0 : index
    %c0_7 = arith.constant 0 : index
    %10 = vector.load %arg4[%c0_6, %c0_7] : memref<256x128xbf16, #tpu.memory_space<vmem>>, vector<256x128xbf16>
    %cst_8 = arith.constant dense<0.000000e+00> : vector<8x128xf32>
    %11 = tpu.matmul %9, %10, %cst_8 {dimension_numbers = #tpu.dot_dimension_numbers<[1], [0], [0], [1], [0, 0, 1, 1], [], []>} : vector<8x256xbf16>, vector<256x128xbf16>, vector<8x128xf32> -> vector<8x128xf32>
    %c0_9 = arith.constant 0 : index
    %c0_10 = arith.constant 0 : index
    %12 = vector.load %arg5[%c0_9, %c0_10] : memref<1x128xf32, #tpu.memory_space<vmem>>, vector<1x128xf32>
    %13 = vector.broadcast %12 : vector<1x128xf32> to vector<8x128xf32>
    %14 = arith.addf %11, %13 : vector<8x128xf32>
    %15 = math.tanh %14 : vector<8x128xf32>
    %c0_11 = arith.constant 0 : index
    %c0_12 = arith.constant 0 : index
    %16 = vector.load %arg6[%c0_11, %c0_12] : memref<8x128xf32, #tpu.memory_space<vmem>>, vector<8x128xf32>
    tpu.vector_store %arg6[%c0_11, %c0_12], %15 {strides = array<i32>} : memref<8x128xf32, #tpu.memory_space<vmem>>, vector<8x128xf32>,
    return
  }
  func.func @transform_0(%arg0: i32) -> (i32, i32) {
    %c0_i32 = arith.constant 0 : i32
    %c0_i32_0 = arith.constant 0 : i32
    return %arg0, %c0_i32 : i32, i32
  }
  func.func @transform_1(%arg0: i32) -> (i32, i32) {
    %c0_i32 = arith.constant 0 : i32
    %c0_i32_0 = arith.constant 0 : i32
    %c0_i32_1 = arith.constant 0 : i32
    return %c0_i32, %c0_i32_0 : i32, i32
  }
  func.func @transform_2(%arg0: i32) -> (i32, i32) {
    %c0_i32 = arith.constant 0 : i32
    %c0_i32_0 = arith.constant 0 : i32
    %c0_i32_1 = arith.constant 0 : i32
    return %c0_i32, %c0_i32_0 : i32, i32
  }
  func.func @transform_3(%arg0: i32) -> (i32, i32) {
    %c0_i32 = arith.constant 0 : i32
    %c0_i32_0 = arith.constant 0 : i32
    %c0_i32_1 = arith.constant 0 : i32
    return %c0_i32, %c0_i32_0 : i32, i32
  }
  func.func @transform_4(%arg0: i32) -> (i32, i32) {
    %c0_i32 = arith.constant 0 : i32
    %c0_i32_0 = arith.constant 0 : i32
    %c0_i32_1 = arith.constant 0 : i32
    return %c0_i32, %c0_i32_0 : i32, i32
  }
  func.func @transform_5(%arg0: i32) -> (i32, i32) {
    %c0_i32 = arith.constant 0 : i32
    %c0_i32_0 = arith.constant 0 : i32
    return %arg0, %c0_i32 : i32, i32
  }
}

</mosaic_0001>

<bundles_post_ra>
// kernel: tpu_custom_call.1
= control target key start
LH: loop header
LB: loop body
LE: loop exit
PB: predicated region body
PF: predicated region fallthrough
CT: control target
= control target key end

     0   :  { %10 = vsyncpa [#allocation3], 0  ;;  %s658_s0 = inlined_call_operand.hbm [shape: f32[8,128], index: 0, kind: input, shape index: {}]   ;;  %s659_s1 = inlined_call_operand.hbm [shape: bf16[128,256], index: 1, kind: input, shape index: {}]   ;;  %s660_s2 = inlined_call_operand.vmem [shape: f32[1,256], index: 2, kind: input, shape index: {}]   ;;  %s661_s3 = inlined_call_operand.hbm [shape: bf16[256,128], index: 3, kind: input, shape index: {}]   ;;  %s662_s4 = inlined_call_operand.vmem [shape: f32[1,128], index: 4, kind: input, shape index: {}]   ;;  %s663_s5 = inlined_call_operand.hbm [shape: f32[8,128], index: 5, kind: output, shape index: {}]  }
   0x1   :  { %11 = vsyncpa [#allocation6], 0 }
   0x2   :  { %12 = vsyncpa [#allocation4], 0  ;;  %s601_s18 = smov [#allocation5]  }
   0x3   :  { %s28_s19 = sshll.u32 %s601_s18, 4  ;;  %s29_s19 = int_to_ptr.vmem [resolvable:$true] %s28_s19 }
   0x4   :  { %s523_s20 = scalar_lea.vmem %s29_s19, 2048  ;;  %p528_p1 = scmp.lt.s32.totalorder %s29_s19, %s29_s19 }
   0x5   :  { %p524_p0 = scmp.ne.s32.totalorder %s29_s19, %s523_s20  ;;  %p529_p2 = scmp.lt.s32.totalorder %s523_s20, %s523_s20 }
   0x7   :  { %p530_p3 = por %p529_p2, %p528_p1 }
   0x9   :  { %p531_p4 = pnand %p530_p3, %p524_p0 }
   0xb   :  { %534 = shalt.err (!%p531_p4)
}
   0xc   :  { %s602_s21 = smov 128   ;;  %s603_s22 = smov 8  }
   0xd   :  { %34 = dma.hbm_to_vmem [thread:$0]  %s659_s1, 2048, %s29_s19, [#allocation6], %s602_s21, %s602_s21, %s603_s22  }
   0xe   :  { %s604_s25 = smov [#allocation2]   ;;  %s605_s27 = smov [#allocation7]  }
   0xf   :  { %s19_s26 = sshll.u32 %s604_s25, 4  ;;  %s42_s28 = sshll.u32 %s605_s27, 4  ;;  %s20_s26 = int_to_ptr.vmem [resolvable:$true] %s19_s26  ;;  %s43_s28 = int_to_ptr.vmem [resolvable:$true] %s42_s28 }
  0x10   :  { %s543_s29 = scalar_lea.vmem %s20_s26, 128  ;;  %p548_p6 = scmp.lt.s32.totalorder %s20_s26, %s20_s26 }
  0x11   :  { %p544_p5 = scmp.ne.s32.totalorder %s20_s26, %s543_s29  ;;  %p549_p7 = scmp.lt.s32.totalorder %s543_s29, %s543_s29 }
  0x13   :  { %p550_p8 = por %p549_p7, %p548_p6 }
  0x15   :  { %p551_p9 = pnand %p550_p8, %p544_p5 }
  0x17   :  { %554 = shalt.err (!%p551_p9)
}
  0x18   :  { %22 = dma.hbm_to_vmem [thread:$0]  %s658_s0, 128, %s20_s26, [#allocation3]  }
  0x19   :  { %s563_s7 = scalar_lea.vmem %s43_s28, 2048  ;;  %p568_p11 = scmp.lt.s32.totalorder %s43_s28, %s43_s28 }
  0x1a   :  { %p564_p10 = scmp.ne.s32.totalorder %s43_s28, %s563_s7  ;;  %p569_p12 = scmp.lt.s32.totalorder %s563_s7, %s563_s7 }
  0x1c   :  { %p570_p13 = por %p569_p12, %p568_p11 }
  0x1e   :  { %p571_p0 = pnand %p570_p13, %p564_p10 }
  0x20   :  { %574 = shalt.err (!%p571_p0)
}
  0x21   :  { %s606_s1 = smov 64   ;;  %s607_s8 = smov 4  }
  0x22   :  { %48 = dma.hbm_to_vmem [thread:$0]  %s661_s3, 2048, %s43_s28, [#allocation6], %s606_s1, %s606_s1, %s607_s8  }
  0x23   :  { %595 = dma.done.wait [#allocation3], 128  }
  0x24   :  { %596 = vsyncadd [#allocation3], 4294967168 }
  0x25   :  { %597 = dma.done.wait [#allocation6], 4096  }
  0x26   :  { %598 = vsyncadd [#allocation6], 4294963200  ;;  %v608_v0 = vmov 0   ;;  %v473_v1 = vld [vmem:[#allocation5 + $0x74] ss:$8 sps:$4 sm:$0xff]   ;;  %v501_v15 = vld [vmem:[#allocation7 + $0x68] sm:$0xff]   ;;  %v81_v35 = vlaneseq }
  0x27   :  { %203 = vmatprep.mubr.bf16.mxu0 %v608_v0  ;;  %v475_v2 = vld [vmem:[#allocation5 + $0x70] ss:$8 sps:$4 sm:$0xff]   ;;  %171 = vmatprep.subr.bf16.mxu0 %v473_v1  ;;  %v476_v3 = vld [vmem:[#allocation5 + $0x64] ss:$8 sps:$4 sm:$0xff]   ;;  %v478_v4 = vld [vmem:[#allocation5 + $0x60] ss:$8 sps:$4 sm:$0xff]  }
  0x28   :  { %172 = vmatpush1.bf16.msra.mxu0 %v475_v2  ;;  %v479_v5 = vld [vmem:[#allocation5 + $0x54] ss:$8 sps:$4 sm:$0xff]   ;;  %v481_v6 = vld [vmem:[#allocation5 + $0x50] ss:$8 sps:$4 sm:$0xff]   ;;  %v482_v7 = vld [vmem:[#allocation5 + $0x44] ss:$8 sps:$4 sm:$0xff]  }
  0x29   :  { %173 = vmatprep.subr.bf16.mxu0 %v476_v3  ;;  %v484_v8 = vld [vmem:[#allocation5 + $0x40] ss:$8 sps:$4 sm:$0xff]   ;;  %v485_v9 = vld [vmem:[#allocation5 + $0x34] ss:$8 sps:$4 sm:$0xff]   ;;  %v487_v12 = vld [vmem:[#allocation5 + $0x30] ss:$8 sps:$4 sm:$0xff]  }
  0x2a   :  { %v497_v10 = vld [vmem:[#allocation7 + $0x78] sm:$0xff]   ;;  %v499_v13 = vld [vmem:[#allocation7 + $0x70] sm:$0xff]   ;;  %v488_v16 = vld [vmem:[#allocation5 + $0x24] ss:$8 sps:$4 sm:$0xff]   ;;  %v82_v36 = vshrl.u32 %v81_v35, 7 }
  0x2b   :  { %v498_v11 = vld [vmem:[#allocation7 + $0x38] sm:$0xff]   ;;  %442 = vmatprep.subr.bf16.mxu1 %v497_v10  ;;  %v500_v14 = vld [vmem:[#allocation7 + $0x30] sm:$0xff]   ;;  %v490_v17 = vld [vmem:[#allocation5 + $0x20] ss:$8 sps:$4 sm:$0xff]  }
  0x2c   :  { %174 = vmatpush1.bf16.msra.mxu0 %v478_v4  ;;  %443 = vmatpush3.bf16.msra.mxu1 %v498_v11  ;;  %v502_v18 = vld [vmem:[#allocation7 + $0x28] sm:$0xff]   ;;  %v503_v19 = vld [vmem:[#allocation7 + $0x60] sm:$0xff]   ;;  %v491_v20 = vld [vmem:[#allocation5 + $0x14] ss:$8 sps:$4 sm:$0xff]   ;;  %v83_v37 = vsub.s32 0, %v82_v36  ;;  %v87_v39 = vsub.s32 1, %v82_v36 }
  0x2d   :  { %175 = vmatprep.subr.bf16.mxu0 %v479_v5  ;;  %444 = vmatprep.subr.bf16.mxu1 %v499_v13  ;;  %v493_v21 = vld [vmem:[#allocation5 + $0x10] ss:$8 sps:$4 sm:$0xff]   ;;  %v494_v22 = vld [vmem:[#allocation5 + $0x4] ss:$8 sps:$4 sm:$0xff]   ;;  %v496_v26 = vld [vmem:[#allocation5] ss:$8 sps:$4 sm:$0xff]  }
  0x2e   :  { %v504_v23 = vld [vmem:[#allocation7 + $0x20] sm:$0xff]   ;;  %v505_v24 = vld [vmem:[#allocation7 + $0x58] sm:$0xff]   ;;  %v507_v28 = vld [vmem:[#allocation7 + $0x50] sm:$0xff]  }
  0x2f   :  { %v506_v25 = vld [vmem:[#allocation7 + $0x18] sm:$0xff]   ;;  %v508_v30 = vld [vmem:[#allocation7 + $0x10] sm:$0xff]   ;;  %v509_v31 = vld [vmem:[#allocation7 + $0x48] sm:$0xff]  }
  0x30   :  { %176 = vmatpush1.bf16.msra.mxu0 %v481_v6  ;;  %445 = vmatpush3.bf16.msra.mxu1 %v500_v14  ;;  %v61_v27 = vld [vmem:[#allocation2] sm:$0xff]  ;;  %v510_v32 = vld [vmem:[#allocation7 + $0x8] sm:$0xff]   ;;  %v511_v33 = vld [vmem:[#allocation7 + $0x40] sm:$0xff]  }
  0x31   :  { %177 = vmatprep.subr.bf16.mxu0 %v482_v7  ;;  %446 = vmatprep.subr.bf16.mxu1 %v501_v15  ;;  %v62_v29 = vpack.c.bf16 %v61_v27, %v61_v27  ;;  %v512_v34 = vld [vmem:[#allocation7] sm:$0xff]   ;;  %v79_v38 = vld [vmem:[%s660_s2] sm:$0x3]  ;;  %s609_s2 = smov [#allocation8]  }
  0x32   :  { %v84_v40 = vrot.slane %v79_v38, %v83_v37  ;;  %v88_v41 = vrot.slane %v79_v38, %v87_v39  ;;  %v425_v53 = vld [vmem:[%s662_s4] ss:$0 sm:$0xff]  ;;  %s399_s13 = sshll.u32 %s609_s2, 4  ;;  %s400_s13 = int_to_ptr.vmem [resolvable:$true] %s399_s13 }
  0x33   :  { %s575_s14 = scalar_lea.vmem %s400_s13, 128  ;;  %p580_p2 = scmp.lt.s32.totalorder %s400_s13, %s400_s13 }
  0x34   :  { %178 = vmatpush1.bf16.msra.mxu0 %v484_v8  ;;  %447 = vmatpush3.bf16.msra.mxu1 %v502_v18  ;;  %p576_p1 = scmp.ne.s32.totalorder %s400_s13, %s575_s14  ;;  %p581_p3 = scmp.lt.s32.totalorder %s575_s14, %s575_s14 }
  0x35   :  { %179 = vmatprep.subr.bf16.mxu0 %v485_v9  ;;  %448 = vmatprep.subr.bf16.mxu1 %v503_v19 }
  0x36   :  { %p582_p4 = por %p581_p3, %p580_p2 }
  0x38   :  { %180 = vmatpush1.bf16.msra.mxu0 %v487_v12  ;;  %449 = vmatpush3.bf16.msra.mxu1 %v504_v23  ;;  %p583_p5 = pnand %p582_p4, %p576_p1 }
  0x39   :  { %181 = vmatprep.subr.bf16.mxu0 %v488_v16  ;;  %450 = vmatprep.subr.bf16.mxu1 %v505_v24 }
  0x3c   :  { %182 = vmatpush1.bf16.msra.mxu0 %v490_v17  ;;  %451 = vmatpush3.bf16.msra.mxu1 %v506_v25 }
  0x3d   :  { %183 = vmatprep.subr.bf16.mxu0 %v491_v20  ;;  %452 = vmatprep.subr.bf16.mxu1 %v507_v28 }
  0x40   :  { %184 = vmatpush1.bf16.msra.mxu0 %v493_v21  ;;  %453 = vmatpush3.bf16.msra.mxu1 %v508_v30 }
  0x41   :  { %185 = vmatprep.subr.bf16.mxu0 %v494_v22  ;;  %454 = vmatprep.subr.bf16.mxu1 %v509_v31 }
  0x44   :  { %186 = vmatpush1.bf16.msra.mxu0 %v496_v26  ;;  %455 = vmatpush3.bf16.msra.mxu1 %v510_v32 }
  0x45   :  { %456 = vmatprep.subr.bf16.mxu1 %v511_v33 }
  0x47   :  { %204 = vmatmul.mubr.bf16.vlgmr.msra.gmra.mxu0 %v62_v29 }
  0x48   :  { %457 = vmatpush3.bf16.msra.mxu1 %v512_v34 }
 0x107   :  { %v205_v42 = vpop.f32.mrf.mxu0 }
 0x108   :  { %v206_v43 = vadd.f32 %v205_v42, %v84_v40 }
 0x109   :  { %v207_v44 = vpop.f32.mrf.mxu0 }
 0x10a   :  { %v208_v45 = vadd.f32 %v207_v44, %v88_v41  ;;  %v212_v46 = vmax.f32 %v206_v43, 0.0 }
 0x10b   :  { %v209_v47 = vpop.f32.mrf.mxu0 }
 0x10c   :  { %v213_v48 = vmax.f32 %v208_v45, 0.0  ;;  %v214_v51 = vpack.c.bf16 %v212_v46, %v212_v46 }
 0x10d   :  { %v210_v49 = vpop.f32.mrf.mxu0 }
 0x10e   :  { %v215_v50 = vpack.c.bf16 %v213_v48, %v213_v48 }
 0x110   :  { %383 = vmatprep.mubr.bf16.mxu1 %v215_v50 }
 0x111   :  { %384 = vmatmul.mubr.bf16.vlgmr.msra.gmra.mxu1 %v214_v51 }
 0x1d1   :  { %v458_v52 = vpop.f32.mrf.mxu1 }
 0x1d3   :  { %v459_v54 = vpop.f32.mrf.mxu1 }
 0x1d4   :  { %v460_v55 = vadd.f32 %v459_v54, %v458_v52 }
 0x1d5   :  { %v461_v56 = vpop.f32.mrf.mxu1 }
 0x1d6   :  { %v386_v57 = vadd.f32 %v460_v55, %v425_v53 }
 0x1d7   :  { %v462_v58 = vpop.f32.mrf.mxu1 }
 0x1d8   :  { %513 = vtanh.f32 %v386_v57 }
 0x1e5   :  { %v514_v59 = vpop.eup %513 }
 0x1e6   :  { %392 = vst [vmem:[#allocation8] sm:$0xff] %v514_v59 }
 0x1e7   :  { %586 = shalt.err (!%p583_p5)
}
 0x1e8   :  { %402 = dma.vmem_to_hbm [thread:$0]  %s400_s13, 128, %s663_s5, [#allocation4]  }
 0x1e9   :  { %599 = dma.done.wait [#allocation4], 128  }
 0x1ea   :  { %600 = vsyncadd [#allocation4], 4294967168 }
 0x1eb   :  { %406 = vsyncpa [#allocation3], 1 }
 0x1ec   :  { %407 = vsyncpa [#allocation6], 1 }
 0x1ed   :  { %408 = vsyncpa [#allocation4], 1 }

</bundles_post_ra>
